<compile_context>
chip_gen: v5e
topology: v5e:2x2
jax: 0.10.0
libtpu: 0.0.40
codegen_flags: <defaults>
</compile_context>

<pallas_src>
import functools

import numpy as np
import jax
import jax.numpy as jnp
from jax import lax
from jax.experimental import pallas as pl
from jax.experimental.pallas import tpu as pltpu

# Module hyper-parameters (from __init__ defaults).
TAU = 1.0
LAMBDA_POS = 100.0
LAMBDA_VR = 0.1
LAMBDA_COV = 5.0
MIN_COVERAGE = 0.3
SPIKE_EPS = 1e-4      # |x| > 1e-4 threshold for spike masks
COV_EPS = 1e-8
POS_EPS = 1e-12
LOG2 = float(np.log(2.0))

# Use the MXU banded-matmul filter only while its weight fits comfortably.
_MAX_W_BYTES = 8 * 1024 * 1024


def _round_up(x: int, m: int) -> int:
    return (x + m - 1) // m * m


def _vmem_budget():
    """(scoped vmem limit, per-step block budget) — TPU-generation aware."""
    try:
        kind = jax.devices()[0].device_kind.lower()
    except Exception:  # pragma: no cover
        kind = ""
    if "v7" in kind:
        # v7x: only 64 MiB physical VMEM per TensorCore -> stay conservative.
        return 32 * 1024 * 1024, 16 * 1024 * 1024
    # v5e / v6e: 128 MiB physical -> wide lane tiles keep DMAs long.
    return 64 * 1024 * 1024, 32 * 1024 * 1024


def _make_kernel(*, has_mask, use_w, taps, pad, t_real, bc_real, lane_tile):
    """Per-lane-tile loss kernel.

    Data rows live at [pad, pad + t_real); real lanes at global columns
    [0, bc_real).  Each grid step writes its own lane-dense partial-sum rows,
    so the grid axis is fully parallel (no carried state).
    """
    L = len(taps)

    def kernel(*refs):
        idx = 0
        if use_w:
            w_ref = refs[idx]
            idx += 1
        pred_ref = refs[idx]
        target_ref = refs[idx + 1]
        idx += 2
        if has_mask:
            mask_ref = refs[idx]
            idx += 1
        out_refs = refs[idx:]
        pos_o, vr_o, ov_o, tc_o = out_refs[0], out_refs[1], out_refs[2], out_refs[3]

        j = pl.program_id(0)

        pred = pred_ref[...]
        target = target_ref[...]
        d = pred - target                     # reused by pos + VR terms
        if has_mask:
            m = mask_ref[...]                 # zero on all padded rows / lanes

        # ---- position loss: sum of log(cosh(d + 1e-12)), per-lane partials ----
        diff = d + POS_EPS
        ax = jnp.abs(diff)
        # numerically stable log(cosh(x)) = |x| + log(1 + exp(-2|x|)) - log(2)
        logcosh = ax + jnp.log(1.0 + jnp.exp(-2.0 * ax)) - LOG2
        if has_mask:
            pos_o[...] = jnp.sum(logcosh * m, axis=0, keepdims=True)
            out_refs[4][...] = jnp.sum(m, axis=0, keepdims=True)   # mask count
        else:
            # iota validity mask (no HBM traffic) to exclude the zero padding
            row = lax.broadcasted_iota(jnp.int32, pred.shape, 0)
            col = lax.broadcasted_iota(jnp.int32, pred.shape, 1) + j * lane_tile
            valid = (row >= pad) & (row < pad + t_real) & (col < bc_real)
            pos_o[...] = jnp.sum(jnp.where(valid, logcosh, 0.0),
                                 axis=0, keepdims=True)

        # ---- van Rossum loss: filter(pred) - filter(target) == filter(d) ----
        if use_w:
            # Banded weight on the MXU; zero rows outside [pad, pad+T) make the
            # padded output rows exactly zero (no row masking needed).
            df = jnp.dot(w_ref[...], d, preferred_element_type=jnp.float32)
            if has_mask:
                vr_o[...] = jnp.sum(df * df * m, axis=0, keepdims=True)
            else:
                vr_o[...] = jnp.sum(df * df, axis=0, keepdims=True)
        else:
            # Tap-MAC fallback for very long T (W would not fit VMEM).
            df = taps[0] * d[0:t_real, :]
            for k in range(1, L):
                df = df + taps[k] * d[k:k + t_real, :]
            if has_mask:
                vr_o[...] = jnp.sum(df * df * m[pad:pad + t_real, :],
                                    axis=0, keepdims=True)
            else:
                vr_o[...] = jnp.sum(df * df, axis=0, keepdims=True)

        # ---- spike coverage (mask applied to both indicators, i.e. m^2) ----
        p_ind = (jnp.abs(pred) > SPIKE_EPS).astype(jnp.float32)
        t_ind = (jnp.abs(target) > SPIKE_EPS).astype(jnp.float32)
        if has_mask:
            p_ind = p_ind * m
            t_ind = t_ind * m
        ov_o[...] = jnp.sum(p_ind * t_ind, axis=0, keepdims=True)
        tc_o[...] = jnp.sum(t_ind, axis=0, keepdims=True)

    return kernel


@functools.partial(
    jax.jit,
    static_argnames=("has_mask", "use_w", "dims", "taps", "lane_tile",
                     "vmem_limit"),
)
def _forward(pred, target, mask, w, *, has_mask, use_w, dims, taps, lane_tile,
             vmem_limit):
    B, T, C = dims
    L = len(taps)
    pad = L // 2
    bc = B * C
    t_arr = _round_up(T + L - 1, 8)          # pad leading + trailing halo rows
    bc_pad = _round_up(bc, lane_tile)

    def to2d(x):
        # lane-dense layout: [T, B*C] (B*C on the 128-lane axis), padded rows
        # at [0, pad) and [pad+T, t_arr).  Transpose + reshape + pad fuse into
        # one XLA copy.
        x2 = jnp.transpose(x.astype(jnp.float32), (1, 0, 2)).reshape(T, bc)
        return jnp.pad(x2, ((pad, t_arr - pad - T), (0, bc_pad - bc)))

    args = []
    in_specs = []
    data_spec = pl.BlockSpec((t_arr, lane_tile), lambda j: (0, j))
    if use_w:
        args.append(w)
        in_specs.append(pl.BlockSpec((t_arr, t_arr), lambda j: (0, 0)))  # resident
    args += [to2d(pred), to2d(target)]
    in_specs += [data_spec, data_spec]
    if has_mask:
        m3 = jnp.broadcast_to(mask.astype(jnp.float32)[:, :, None], (B, T, C))
        args.append(to2d(m3))
        in_specs.append(data_spec)

    n_out = 5 if has_mask else 4
    lane_out = jax.ShapeDtypeStruct((1, bc_pad), jnp.float32)
    out_spec = pl.BlockSpec((1, lane_tile), lambda j: (0, j))

    partials = pl.pallas_call(
        _make_kernel(has_mask=has_mask, use_w=use_w, taps=taps, pad=pad,
                     t_real=T, bc_real=bc, lane_tile=lane_tile),
        grid=(bc_pad // lane_tile,),
        out_shape=tuple([lane_out] * n_out),
        in_specs=in_specs,
        out_specs=tuple([out_spec] * n_out),
        compiler_params=pltpu.CompilerParams(
            dimension_semantics=("parallel",),   # megacore-shardable on v7x
            vmem_limit_bytes=vmem_limit,
        ),
    )(*args)

    # Tiny epilogue in plain JAX: lane reductions + coverage penalty.
    pos_sum = jnp.sum(partials[0])
    vr_sum = jnp.sum(partials[1])
    ov_sum = jnp.sum(partials[2])
    tc_sum = jnp.sum(partials[3])
    if has_mask:
        count = jnp.sum(partials[4])
    else:
        count = jnp.float32(B * T * C)
    pos_loss = pos_sum / count
    vr_loss = vr_sum / count
    coverage = ov_sum / (tc_sum + COV_EPS)
    penalty = jnp.maximum(MIN_COVERAGE - coverage, 0.0) * LAMBDA_COV
    return LAMBDA_POS * pos_loss + LAMBDA_VR * vr_loss + penalty


def spike_position_loss_delta(pred, target, mask=None, tau=TAU,
                              force_tap_filter=False):
    """pred, target: [B, T, C] float; mask: optional [B, T]."""
    B, T, C = pred.shape
    L = int(6 * tau)
    pad = L // 2
    taps = tuple(float(np.exp(-k / tau)) for k in range(L))
    bc = B * C
    t_arr = _round_up(T + L - 1, 8)

    vmem_limit, block_budget = _vmem_budget()
    w_bytes = t_arr * t_arr * 4
    use_w = (not force_tap_filter) and (w_bytes <= _MAX_W_BYTES)

    # Lane tile: as wide as the per-step VMEM budget allows (128-aligned).
    n_streams = 3 if mask is not None else 2
    per_lane = t_arr * 4 * n_streams * 2            # double-buffered f32 inputs
    budget = block_budget - (2 * w_bytes if use_w else 0)
    cap = max(128, (max(budget, per_lane * 128) // per_lane) // 128 * 128)
    lane_tile = min(min(_round_up(bc, 128), 2048), cap)

    w = None
    if use_w:
        # Banded conv weight: W[r, s] = exp(-(s - (r - pad)) / tau) on the band,
        # only for output rows r in [pad, pad+T).  Edges (left/right zero
        # padding of the PyTorch conv1d) are handled by the band clipping.
        r = np.arange(t_arr)[:, None]
        s = np.arange(t_arr)[None, :]
        k = s - (r - pad)
        band = (k >= 0) & (k < L) & (r >= pad) & (r < pad + T)
        w = jnp.asarray(
            np.where(band, np.exp(-np.clip(k, 0, L - 1) / tau), 0.0)
            .astype(np.float32))

    return _forward(pred, target, mask, w,
                    has_mask=mask is not None, use_w=use_w, dims=(B, T, C),
                    taps=taps, lane_tile=lane_tile, vmem_limit=vmem_limit)


def _reference_loss(pred, target, mask, tau=TAU):
    """Plain-JAX reference mirroring the PyTorch forward."""
    B, T, C = pred.shape
    L = int(6 * tau)
    pad = L // 2
    t_idx = np.arange(T)[:, None]
    s_idx = np.arange(T)[None, :]
    k = s_idx - t_idx + pad
    w = jnp.asarray(
        np.where((k >= 0) & (k < L),
                 np.exp(-np.clip(k, 0, L - 1).astype(np.float32) / tau), 0.0),
        dtype=jnp.float32)
    if mask is None:
        mask_exp = jnp.ones((B, T, C), jnp.float32)
    else:
        mask_exp = jnp.broadcast_to(mask.astype(jnp.float32)[:, :, None],
                                    (B, T, C))
    diff = pred - target + POS_EPS
    count = jnp.sum(mask_exp)
    pos_loss = jnp.sum(jnp.log(jnp.cosh(diff)) * mask_exp) / count
    pf = jnp.einsum("ts,bsc->btc", w, pred)
    tf = jnp.einsum("ts,bsc->btc", w, target)
    dfil = pf - tf
    vr_loss = jnp.sum(dfil * dfil * mask_exp) / count
    pm = (jnp.abs(pred) > SPIKE_EPS).astype(jnp.float32) * mask_exp
    tm = (jnp.abs(target) > SPIKE_EPS).astype(jnp.float32) * mask_exp
    coverage = jnp.sum(pm * tm) / (jnp.sum(tm) + COV_EPS)
    penalty = jnp.maximum(MIN_COVERAGE - coverage, 0.0) * LAMBDA_COV
    return LAMBDA_POS * pos_loss + LAMBDA_VR * vr_loss + penalty


if __name__ == "__main__":
    B, T, C = 2, 16, 8
    key = jax.random.PRNGKey(0)
    k1, k2, k3, k4, k5 = jax.random.split(key, 5)

    # sparse delta-encoded spike-like signals
    raw_p = jax.random.normal(k1, (B, T, C), dtype=jnp.float32)
    raw_t = jax.random.normal(k2, (B, T, C), dtype=jnp.float32)
    pred = jnp.where(jax.random.uniform(k3, (B, T, C)) < 0.35, raw_p, 0.0)
    target = jnp.where(jax.random.uniform(k4, (B, T, C)) < 0.35, raw_t, 0.0)
    mask = (jax.random.uniform(k5, (B, T)) < 0.8).astype(jnp.float32)

    cases = [
        ("no_mask/mxu", None, False),
        ("mask/mxu", mask, False),
        ("no_mask/taps", None, True),
        ("mask/taps", mask, True),
    ]
    for name, m, force_taps in cases:
        got = jax.block_until_ready(
            spike_position_loss_delta(pred, target, m,
                                      force_tap_filter=force_taps))
        want = jax.block_until_ready(_reference_loss(pred, target, m))
        if not np.allclose(np.asarray(got), np.asarray(want),
                           rtol=1e-4, atol=1e-4):
            raise AssertionError(f"{name} mismatch: kernel={got} ref={want}")

    print("KERNEL_OK")
</pallas_src>

<mosaic_0001>
module attributes {stable_mosaic.version = 11 : i64} {
  func.func @kernel(%arg0: i32, %arg1: memref<24x24xf32, #tpu.memory_space<vmem>>, %arg2: memref<24x128xf32, #tpu.memory_space<vmem>>, %arg3: memref<24x128xf32, #tpu.memory_space<vmem>>, %arg4: memref<1x128xf32, #tpu.memory_space<vmem>>, %arg5: memref<1x128xf32, #tpu.memory_space<vmem>>, %arg6: memref<1x128xf32, #tpu.memory_space<vmem>>, %arg7: memref<1x128xf32, #tpu.memory_space<vmem>>) attributes {dimension_semantics = [#tpu.dimension_semantics<parallel>], iteration_bounds = array<i64: 1>, scalar_prefetch = 0 : i64, scratch_operands = 0 : i64, tpu.core_type = #tpu.core_type<tc>, window_params = [{pipeline_mode = #tpu.pipeline_mode<synchronous>, transform_indices = @transform_0, window_bounds = array<i64: 24, 24>}, {transform_indices = @transform_1, window_bounds = array<i64: 24, 128>}, {transform_indices = @transform_2, window_bounds = array<i64: 24, 128>}, {transform_indices = @transform_3, window_bounds = array<i64: 1, 128>}, {transform_indices = @transform_4, window_bounds = array<i64: 1, 128>}, {transform_indices = @transform_5, window_bounds = array<i64: 1, 128>}, {transform_indices = @transform_6, window_bounds = array<i64: 1, 128>}]} {
    %c0 = arith.constant 0 : index
    %c0_0 = arith.constant 0 : index
    %0 = vector.load %arg2[%c0, %c0_0] : memref<24x128xf32, #tpu.memory_space<vmem>>, vector<24x128xf32>
    %c0_1 = arith.constant 0 : index
    %c0_2 = arith.constant 0 : index
    %1 = vector.load %arg3[%c0_1, %c0_2] : memref<24x128xf32, #tpu.memory_space<vmem>>, vector<24x128xf32>
    %2 = arith.subf %0, %1 : vector<24x128xf32>
    %cst = arith.constant 9.99999996E-13 : f32
    %3 = vector.broadcast %cst : f32 to vector<24x128xf32>
    %4 = arith.addf %2, %3 : vector<24x128xf32>
    %5 = math.absf %4 : vector<24x128xf32>
    %cst_3 = arith.constant -2.000000e+00 : f32
    %6 = vector.broadcast %cst_3 : f32 to vector<24x128xf32>
    %7 = arith.mulf %6, %5 : vector<24x128xf32>
    %8 = math.exp %7 : vector<24x128xf32>
    %cst_4 = arith.constant 1.000000e+00 : f32
    %9 = vector.broadcast %cst_4 : f32 to vector<24x128xf32>
    %10 = arith.addf %9, %8 : vector<24x128xf32>
    %11 = math.log %10 : vector<24x128xf32>
    %12 = arith.addf %5, %11 : vector<24x128xf32>
    %cst_5 = arith.constant 0.693147182 : f32
    %13 = vector.broadcast %cst_5 : f32 to vector<24x128xf32>
    %14 = arith.subf %12, %13 : vector<24x128xf32>
    %15 = tpu.iota {dimensions = array<i32: 0>} : vector<24x128xi32>
    %16 = tpu.iota {dimensions = array<i32: 1>} : vector<24x128xi32>
    %c128_i32 = arith.constant 128 : i32
    %17 = arith.muli %arg0, %c128_i32 : i32
    %18 = vector.broadcast %17 : i32 to vector<24x128xi32>
    %19 = arith.addi %16, %18 : vector<24x128xi32>
    %c3_i32 = arith.constant 3 : i32
    %20 = vector.broadcast %c3_i32 : i32 to vector<24x128xi32>
    %21 = arith.cmpi sge, %15, %20 : vector<24x128xi32>
    %c19_i32 = arith.constant 19 : i32
    %22 = vector.broadcast %c19_i32 : i32 to vector<24x128xi32>
    %23 = arith.cmpi slt, %15, %22 : vector<24x128xi32>
    %24 = arith.andi %21, %23 : vector<24x128xi1>
    %c16_i32 = arith.constant 16 : i32
    %25 = vector.broadcast %c16_i32 : i32 to vector<24x128xi32>
    %26 = arith.cmpi slt, %19, %25 : vector<24x128xi32>
    %27 = arith.andi %24, %26 : vector<24x128xi1>
    %cst_6 = arith.constant 0.000000e+00 : f32
    %28 = vector.broadcast %cst_6 : f32 to vector<24x128xf32>
    %29 = arith.select %27, %14, %28 : vector<24x128xi1>, vector<24x128xf32>
    %cst_7 = arith.constant dense<0.000000e+00> : vector<128xf32>
    %30 = vector.multi_reduction <add>, %29, %cst_7 [0] : vector<24x128xf32> to vector<128xf32>
    %31 = vector.shape_cast %30 : vector<128xf32> to vector<1x128xf32>
    %c0_8 = arith.constant 0 : index
    %c0_9 = arith.constant 0 : index
    %32 = vector.load %arg4[%c0_8, %c0_9] : memref<1x128xf32, #tpu.memory_space<vmem>>, vector<1x128xf32>
    tpu.vector_store %arg4[%c0_8, %c0_9], %31 {strides = array<i32>} : memref<1x128xf32, #tpu.memory_space<vmem>>, vector<1x128xf32>,
    %c0_10 = arith.constant 0 : index
    %c0_11 = arith.constant 0 : index
    %33 = vector.load %arg1[%c0_10, %c0_11] : memref<24x24xf32, #tpu.memory_space<vmem>>, vector<24x24xf32>
    %cst_12 = arith.constant dense<0.000000e+00> : vector<24x128xf32>
    %34 = tpu.matmul %33, %2, %cst_12 {dimension_numbers = #tpu.dot_dimension_numbers<[1], [0], [0], [1], [0, 0, 1, 1], [], []>} : vector<24x24xf32>, vector<24x128xf32>, vector<24x128xf32> -> vector<24x128xf32>
    %35 = arith.mulf %34, %34 : vector<24x128xf32>
    %cst_13 = arith.constant dense<0.000000e+00> : vector<128xf32>
    %36 = vector.multi_reduction <add>, %35, %cst_13 [0] : vector<24x128xf32> to vector<128xf32>
    %37 = vector.shape_cast %36 : vector<128xf32> to vector<1x128xf32>
    %c0_14 = arith.constant 0 : index
    %c0_15 = arith.constant 0 : index
    %38 = vector.load %arg5[%c0_14, %c0_15] : memref<1x128xf32, #tpu.memory_space<vmem>>, vector<1x128xf32>
    tpu.vector_store %arg5[%c0_14, %c0_15], %37 {strides = array<i32>} : memref<1x128xf32, #tpu.memory_space<vmem>>, vector<1x128xf32>,
    %39 = math.absf %0 : vector<24x128xf32>
    %cst_16 = arith.constant 9.99999974E-5 : f32
    %40 = vector.broadcast %cst_16 : f32 to vector<24x128xf32>
    %41 = arith.cmpf ogt, %39, %40 : vector<24x128xf32>
    %42 = arith.extui %41 : vector<24x128xi1> to vector<24x128xi32>
    %43 = arith.sitofp %42 : vector<24x128xi32> to vector<24x128xf32>
    %44 = math.absf %1 : vector<24x128xf32>
    %cst_17 = arith.constant 9.99999974E-5 : f32
    %45 = vector.broadcast %cst_17 : f32 to vector<24x128xf32>
    %46 = arith.cmpf ogt, %44, %45 : vector<24x128xf32>
    %47 = arith.extui %46 : vector<24x128xi1> to vector<24x128xi32>
    %48 = arith.sitofp %47 : vector<24x128xi32> to vector<24x128xf32>
    %49 = arith.mulf %43, %48 : vector<24x128xf32>
    %cst_18 = arith.constant dense<0.000000e+00> : vector<128xf32>
    %50 = vector.multi_reduction <add>, %49, %cst_18 [0] : vector<24x128xf32> to vector<128xf32>
    %51 = vector.shape_cast %50 : vector<128xf32> to vector<1x128xf32>
    %c0_19 = arith.constant 0 : index
    %c0_20 = arith.constant 0 : index
    %52 = vector.load %arg6[%c0_19, %c0_20] : memref<1x128xf32, #tpu.memory_space<vmem>>, vector<1x128xf32>
    tpu.vector_store %arg6[%c0_19, %c0_20], %51 {strides = array<i32>} : memref<1x128xf32, #tpu.memory_space<vmem>>, vector<1x128xf32>,
    %cst_21 = arith.constant dense<0.000000e+00> : vector<128xf32>
    %53 = vector.multi_reduction <add>, %48, %cst_21 [0] : vector<24x128xf32> to vector<128xf32>
    %54 = vector.shape_cast %53 : vector<128xf32> to vector<1x128xf32>
    %c0_22 = arith.constant 0 : index
    %c0_23 = arith.constant 0 : index
    %55 = vector.load %arg7[%c0_22, %c0_23] : memref<1x128xf32, #tpu.memory_space<vmem>>, vector<1x128xf32>
    tpu.vector_store %arg7[%c0_22, %c0_23], %54 {strides = array<i32>} : memref<1x128xf32, #tpu.memory_space<vmem>>, vector<1x128xf32>,
    return
  }
  func.func @transform_0(%arg0: i32) -> (i32, i32) {
    %c0_i32 = arith.constant 0 : i32
    %c0_i32_0 = arith.constant 0 : i32
    %c0_i32_1 = arith.constant 0 : i32
    return %c0_i32, %c0_i32_0 : i32, i32
  }
  func.func @transform_1(%arg0: i32) -> (i32, i32) {
    %c0_i32 = arith.constant 0 : i32
    %c0_i32_0 = arith.constant 0 : i32
    return %c0_i32, %arg0 : i32, i32
  }
  func.func @transform_2(%arg0: i32) -> (i32, i32) {
    %c0_i32 = arith.constant 0 : i32
    %c0_i32_0 = arith.constant 0 : i32
    return %c0_i32, %arg0 : i32, i32
  }
  func.func @transform_3(%arg0: i32) -> (i32, i32) {
    %c0_i32 = arith.constant 0 : i32
    %c0_i32_0 = arith.constant 0 : i32
    return %c0_i32, %arg0 : i32, i32
  }
  func.func @transform_4(%arg0: i32) -> (i32, i32) {
    %c0_i32 = arith.constant 0 : i32
    %c0_i32_0 = arith.constant 0 : i32
    return %c0_i32, %arg0 : i32, i32
  }
  func.func @transform_5(%arg0: i32) -> (i32, i32) {
    %c0_i32 = arith.constant 0 : i32
    %c0_i32_0 = arith.constant 0 : i32
    return %c0_i32, %arg0 : i32, i32
  }
  func.func @transform_6(%arg0: i32) -> (i32, i32) {
    %c0_i32 = arith.constant 0 : i32
    %c0_i32_0 = arith.constant 0 : i32
    return %c0_i32, %arg0 : i32, i32
  }
}

</mosaic_0001>

<bundles_post_ra>
// kernel: _forward.1
= control target key start
LH: loop header
LB: loop body
LE: loop exit
PB: predicated region body
PF: predicated region fallthrough
CT: control target
= control target key end

     0   :  { %vm94_vm0 = vcmask 195584   ;;  %v57_v29 = vlaneseq  ;;  %v234_v34 = vmov 0.0   ;;  %s337_s1 = inlined_call_operand.vmem [shape: f32[24,128], index: 1, kind: input, shape index: {}]   ;;  %s338_s2 = inlined_call_operand.vmem [shape: f32[24,128], index: 2, kind: input, shape index: {}]   ;;  %s339_s0 = inlined_call_operand.vmem [shape: f32[24,24], index: 0, kind: input, shape index: {}]   ;;  %s340_s6 = inlined_call_operand.vmem [shape: f32[1,128], index: 6, kind: output, shape index: {3}]   ;;  %s341_s5 = inlined_call_operand.vmem [shape: f32[1,128], index: 5, kind: output, shape index: {2}]   ;;  %s342_s3 = inlined_call_operand.vmem [shape: f32[1,128], index: 3, kind: output, shape index: {0}]   ;;  %s343_s4 = inlined_call_operand.vmem [shape: f32[1,128], index: 4, kind: output, shape index: {1}]  }
   0x1   :  { %v20_v0 = vld [vmem:[%s337_s1 + $0x10] sm:$0xff]  ;;  %v19_v2 = vld [vmem:[%s337_s1 + $0x8] sm:$0xff]  ;;  %v285_v5 = vld [vmem:[%s337_s1] sm:$0xff] }
   0x2   :  { %v23_v1 = vld [vmem:[%s338_s2 + $0x10] sm:$0xff]  ;;  %v22_v4 = vld [vmem:[%s338_s2 + $0x8] sm:$0xff]  ;;  %v21_v7 = vld [vmem:[%s338_s2] sm:$0xff]  ;;  %v143_v24 = vand.u32 2147483647, %v19_v2  ;;  %v58_v37 = vshrl.u32 %v57_v29, 7 }
   0x3   :  { %v26_v3 = vsub.f32 %v20_v0, %v23_v1  ;;  %v25_v6 = vsub.f32 %v19_v2, %v22_v4  ;;  %v24_v10 = vsub.f32 %v285_v5, %v21_v7  ;;  %v93_v12 = vld [vmem:[%s339_s0 + $0x10] sm:$0xff]  ;;  %v91_v14 = vld [vmem:[%s339_s0] sm:$0xff]  ;;  %v92_v17 = vld [vmem:[%s339_s0 + $0x8] sm:$0xff]  ;;  %v155_v25 = vand.u32 2147483647, %v22_v4 }
   0x4   :  { %v144_v26 = vand.u32 2147483647, %v20_v0  ;;  %v156_v27 = vand.u32 2147483647, %v23_v1  ;;  %vm146_vm1 = vcmp.gt.f32.partialorder %v143_v24, 0.0001 }
   0x5   :  { %v290_v8 = vadd.f32 1e-12, %v26_v3  ;;  %216 = vmatpush.msra.mxu2 %v26_v3  ;;  %117 = vmatpush.msra.mxu0 %v26_v3  ;;  %v292_v9 = vadd.f32 1e-12, %v25_v6  ;;  %v305_v16 = vadd.f32 1e-12, %v24_v10 }
   0x6   :  { %215 = vmatpush.msra.mxu1 %v26_v3  ;;  %vm158_vm2 = vcmp.gt.f32.partialorder %v155_v25, 0.0001  ;;  %vm147_vm3 = vcmp.gt.f32.partialorder %v144_v26, 0.0001  ;;  %vm159_vm4 = vcmp.gt.f32.partialorder %v156_v27, 0.0001 }
   0x7   :  { %v32_v11 = vand.u32 2147483647, %v290_v8  ;;  %218 = vmatpush.msra.mxu2 %v25_v6  ;;  %118 = vmatpush.msra.mxu0 %v25_v6  ;;  %v31_v13 = vand.u32 2147483647, %v292_v9  ;;  %v30_v20 = vand.u32 2147483647, %v305_v16 }
   0x8   :  { %217 = vmatpush.msra.mxu1 %v25_v6  ;;  %v210_v35 = vsel %vm146_vm1, 1.0, %v234_v34  ;;  %v213_v36 = vsel %vm158_vm2, 1.0, %v234_v34  ;;  %v142_v39 = vand.u32 2147483647, %v285_v5  ;;  %v154_v40 = vand.u32 2147483647, %v21_v7 }
   0x9   :  { %v35_v15 = vmul.f32 -2.0, %v32_v11  ;;  %220 = vmatpush.msra.mxu2 %v24_v10  ;;  %119 = vmatpush.msra.mxu0 %v24_v10  ;;  %v34_v18 = vmul.f32 -2.0, %v31_v13  ;;  %v33_v22 = vmul.f32 -2.0, %v30_v20  ;;  %v211_v41 = vsel %vm147_vm3, 1.0, %v234_v34 }
   0xa   :  { %208 = vmatmul.msk.f32.vlgmr.msra.gmra.mxu2 %vm94_vm0, %v93_v12  ;;  %219 = vmatpush.msra.mxu1 %v24_v10  ;;  %v214_v42 = vsel %vm159_vm4, 1.0, %v234_v34  ;;  %v167_v43 = vmul.f32 %v213_v36, %v210_v35  ;;  %vm145_vm5 = vcmp.gt.f32.partialorder %v142_v39, 0.0001  ;;  %vm157_vm6 = vcmp.gt.f32.partialorder %v154_v40, 0.0001 }
   0xb   :  { %v40_v19 = vmul.f32 1.442695, %v35_v15  ;;  %206 = vmatmul.msk.f32.vlgmr.msra.gmra.mxu0 %vm94_vm0, %v91_v14  ;;  %207 = vmatmul.msk.f32.vlgmr.msra.gmra.mxu1 %vm94_vm0, %v92_v17  ;;  %v38_v21 = vmul.f32 1.442695, %v34_v18  ;;  %v36_v23 = vmul.f32 1.442695, %v33_v22  ;;  %v168_v48 = vmul.f32 %v214_v42, %v211_v41 }
   0xc   :  { %v209_v44 = vsel %vm145_vm5, 1.0, %v234_v34  ;;  %v212_v45 = vsel %vm157_vm6, 1.0, %v234_v34  ;;  %v60_v47 = vadd.s32 16, %v58_v37  ;;  %v62_v53 = vand.u32 127, %v57_v29 }
   0xd   :  { %222 = vpow2.f32 %v40_v19  ;;  %v166_v49 = vmul.f32 %v212_v45, %v209_v44  ;;  %v178_v50 = vadd.f32 %v213_v36, %v212_v45  ;;  %vm66_vm9 = vcmp.ge.s32.totalorder %v58_v37, 3 }
   0xe   :  { %224 = vpow2.f32 %v38_v21  ;;  %vm71_vm7 = vcmp.lt.s32.totalorder %v60_v47, 19  ;;  %vm75_vm8 = vcmp.lt.s32.totalorder %v62_v53, 16 }
   0xf   :  { %226 = vpow2.f32 %v36_v23  ;;  %v169_v55 = vadd.f32 %v167_v43, %v166_v49  ;;  %v179_v56 = vadd.f32 %v214_v42, %v178_v50  ;;  %vm78_vm10 = vmand %vm71_vm7, %vm75_vm8 }
  0x10   :  { %vm76_vm11 = vmand %vm66_vm9, %vm75_vm8 }
  0x11   :  { %v170_v60 = vadd.f32 %v169_v55, %v168_v48  ;;  %v180_v61 = vrot.slane %v179_v56, 4 }
  0x13   :  { %v223_v28 = vpop.eup %222  ;;  %v171_v0 = vrot.slane %v170_v60, 4  ;;  %v181_v1 = vadd.f32 %v180_v61, %v179_v56 }
  0x14   :  { %v225_v30 = vpop.eup %224  ;;  %v44_v31 = vadd.f32 1.0, %v223_v28 }
  0x15   :  { %v43_v32 = vadd.f32 1.0, %v225_v30  ;;  %v227_v33 = vpop.eup %226  ;;  %v172_v4 = vadd.f32 %v171_v0, %v170_v60  ;;  %v182_v5 = vrot.slane %v181_v1, 2 }
  0x16   :  { %228 = vlog2.f32 %v44_v31  ;;  %v42_v38 = vadd.f32 1.0, %v227_v33 }
  0x17   :  { %230 = vlog2.f32 %v43_v32  ;;  %v173_v8 = vrot.slane %v172_v4, 2  ;;  %v183_v9 = vadd.f32 %v182_v5, %v181_v1 }
  0x18   :  { %232 = vlog2.f32 %v42_v38 }
  0x19   :  { %v184_v14 = vrot.slane %v183_v9, 1 }
  0x1b   :  { %v185_v18 = vadd.f32 %v184_v14, %v183_v9 }
  0x1c   :  { %v229_v46 = vpop.eup %228 }
  0x1d   :  { %v231_v51 = vpop.eup %230  ;;  %v50_v52 = vmul.f32 0.6931472, %v229_v46  ;;  %186 = vst [vmem:[%s340_s6] sm:$0x1] %v185_v18 }
  0x1e   :  { %v48_v54 = vmul.f32 0.6931472, %v231_v51  ;;  %v233_v58 = vpop.eup %232 }
  0x1f   :  { %v53_v57 = vadd.f32 %v50_v52, %v32_v11  ;;  %v46_v62 = vmul.f32 0.6931472, %v233_v58 }
  0x20   :  { %v52_v59 = vadd.f32 %v48_v54, %v31_v13  ;;  %v174_v13 = vadd.f32 %v173_v8, %v172_v4 }
  0x21   :  { %v205_v2 = vadd.f32 -0.6931472, %v53_v57  ;;  %v51_v3 = vadd.f32 %v46_v62, %v30_v20 }
  0x22   :  { %v204_v63 = vadd.f32 -0.6931472, %v52_v59  ;;  %v175_v17 = vrot.slane %v174_v13, 1 }
  0x23   :  { %v203_v7 = vadd.f32 -0.6931472, %v51_v3  ;;  %v81_v10 = vsel %vm78_vm10, %v205_v2, 0.0 }
  0x24   :  { %v80_v6 = vsel %vm75_vm8, %v204_v63, 0.0  ;;  %v176_v21 = vadd.f32 %v175_v17, %v174_v13 }
  0x25   :  { %v79_v11 = vsel %vm76_vm11, %v203_v7, 0.0 }
  0x26   :  { %v82_v12 = vadd.f32 %v80_v6, %v79_v11  ;;  %177 = vst [vmem:[%s341_s5] sm:$0x1] %v176_v21 }
  0x28   :  { %v83_v15 = vadd.f32 %v82_v12, %v81_v10 }
  0x2a   :  { %v84_v19 = vrot.slane %v83_v15, 4 }
  0x2c   :  { %v85_v16 = vadd.f32 %v84_v19, %v83_v15 }
  0x2e   :  { %v86_v20 = vrot.slane %v85_v16, 2 }
  0x30   :  { %v87_v22 = vadd.f32 %v86_v20, %v85_v16 }
  0x32   :  { %v88_v23 = vrot.slane %v87_v22, 1 }
  0x34   :  { %v89_v24 = vadd.f32 %v88_v23, %v87_v22 }
  0x36   :  { %90 = vst [vmem:[%s342_s3] sm:$0x1] %v89_v24 }
  0x88   :  { %v121_v25 = vpop.f32.mrf.mxu0  ;;  %v124_v26 = vpop.f32.mrf.mxu1 }
  0x89   :  { %v130_v27 = vmul.f32 %v121_v25, %v121_v25  ;;  %v131_v28 = vmul.f32 %v124_v26, %v124_v26 }
  0x8b   :  { %v133_v29 = vadd.f32 %v131_v28, %v130_v27 }
  0x8d   :  { %v127_v30 = vpop.f32.mrf.mxu2 }
  0x8e   :  { %v132_v31 = vmul.f32 %v127_v30, %v127_v30 }
  0x90   :  { %v134_v32 = vadd.f32 %v133_v29, %v132_v31 }
  0x92   :  { %v135_v33 = vrot.slane %v134_v32, 4 }
  0x94   :  { %v136_v34 = vadd.f32 %v135_v33, %v134_v32 }
  0x96   :  { %v137_v35 = vrot.slane %v136_v34, 2 }
  0x98   :  { %v138_v36 = vadd.f32 %v137_v35, %v136_v34 }
  0x9a   :  { %v139_v37 = vrot.slane %v138_v36, 1 }
  0x9c   :  { %v140_v38 = vadd.f32 %v139_v37, %v138_v36 }
  0x9e   :  { %141 = vst [vmem:[%s343_s4] sm:$0x1] %v140_v38 }

</bundles_post_ra>
